<compile_context>
chip_gen: v7x
topology: tpu7x:2x2x1
jax: 0.10.0
libtpu: 0.0.40
codegen_flags: <defaults>
</compile_context>

<pallas_src>
import functools

import jax
import jax.numpy as jnp
import numpy as np
from jax.experimental import pallas as pl
from jax.experimental.pallas import tpu as pltpu


def _focal_kernel(x_ref, t_ref, alpha_ref, sum_f_ref, sum_a_ref, acc_f, acc_a,
                  *, gamma, smooth, num_class, rows_tile, tiles_per_chunk,
                  total_rows):
    tt = pl.program_id(2)

    # Reset per-(batch, chunk) accumulators on the first reduction step.
    @pl.when(tt == 0)
    def _():
        sum_f_ref[...] = jnp.zeros_like(sum_f_ref)
        sum_a_ref[...] = jnp.zeros_like(sum_a_ref)
        acc_f[...] = jnp.zeros_like(acc_f)
        acc_a[...] = jnp.zeros_like(acc_a)

    t = t_ref[0].astype(jnp.int32)                         # (rows_tile, 128)

    # Validity mask: rows past the end of the spatial axis (partial last tile)
    # and padded target positions (t == -1) contribute nothing.  Applied with
    # jnp.where so NaN/Inf garbage in out-of-range rows cannot poison the sum.
    row_base = (pl.program_id(1) * tiles_per_chunk + tt) * rows_tile
    row_ids = row_base + jax.lax.broadcasted_iota(jnp.int32, (rows_tile, 128), 0)
    valid = (row_ids < total_rows) & (t >= 0)

    # Pass 1: per-pixel max over classes (pure VPU, dense vregs).
    m = x_ref[0, 0].astype(jnp.float32)
    for k in range(1, num_class):
        m = jnp.maximum(m, x_ref[0, k].astype(jnp.float32))

    # Pass 2: softmax denominator + target-class gather via compare/select.
    denom = jnp.zeros((rows_tile, 128), jnp.float32)
    e_sel = jnp.zeros((rows_tile, 128), jnp.float32)
    a_sel = jnp.zeros((rows_tile, 128), jnp.float32)
    if smooth is not None:
        # torch.clamp(one_hot, smooth, 1 - smooth) semantics (max then min).
        key_hi = float(min(max(1.0, smooth), 1.0 - smooth))
        key_lo = float(min(max(0.0, smooth), 1.0 - smooth))
    for k in range(num_class):
        ek = jnp.exp(x_ref[0, k].astype(jnp.float32) - m)
        denom = denom + ek
        is_k = t == k
        a_sel = jnp.where(is_k, alpha_ref[k], a_sel)       # scalar SMEM read
        if smooth is None:
            e_sel = jnp.where(is_k, ek, e_sel)
        else:
            e_sel = e_sel + jnp.where(is_k, key_hi, key_lo) * ek

    # Normalize only the gathered (rows_tile, 128) target row: one EUP
    # reciprocal per pixel (exact; approx=True would miss the 1e-5 tolerance).
    inv = pl.reciprocal(denom, approx=False)
    pt = e_sel * inv + 1e-10
    logpt = jnp.log(pt)
    one_minus = 1.0 - pt
    if gamma == 2.0:
        wgt = one_minus * one_minus                        # no EUP pow for default gamma
    elif float(gamma).is_integer() and 0.0 <= gamma <= 8.0:
        wgt = jnp.ones_like(one_minus)
        for _ in range(int(gamma)):
            wgt = wgt * one_minus
    else:
        # Float exponent: clamp base >= 0 so a pt that rounds to 1 can't NaN.
        wgt = jnp.power(jnp.maximum(one_minus, 0.0), gamma)
    f = -wgt * logpt

    acc_f[...] += jnp.where(valid, f, 0.0)
    acc_a[...] += jnp.where(valid, a_sel, 0.0)

    # Single scalar reduce + tiny output store per (batch, chunk).
    @pl.when(tt == pl.num_programs(2) - 1)
    def _():
        sum_f_ref[...] += jnp.sum(acc_f[...])
        sum_a_ref[...] += jnp.sum(acc_a[...])


def multi_focal_loss_pallas(x, target, alpha_vec, *, gamma=2.0, smooth=None,
                            size_average=True, rows_tile=None):
    """x: (N, C, H, W) float; target: (N, H, W) int; alpha_vec: (C,) float."""
    n, c, h, w = x.shape
    hw = h * w
    m_pixels = n * hw
    smooth = float(smooth) if smooth else None             # torch: `if self.smooth:`

    hw128 = ((hw + 127) // 128) * 128
    xr = x.reshape(n, c, hw)                                # free, contiguous
    tr = target.reshape(n, hw)                              # keep narrow int dtypes
    if hw128 != hw:
        # TODO(synk): only hit when H*W % 128 != 0; this pad copies the logits
        # once in HBM.  All other padding/boundary handling is done in-kernel.
        xr = jnp.pad(xr, ((0, 0), (0, 0), (0, hw128 - hw)))
        tr = jnp.pad(tr, ((0, 0), (0, hw128 - hw)), constant_values=-1)
    rows = hw128 // 128
    xr = xr.reshape(n, c, rows, 128)                        # dense (rows, 128) layout
    tr = tr.reshape(n, rows, 128)

    # Tile sizing: <= ~2 MiB of f32 logits per block, <= 512 sublane rows,
    # rows_tile a multiple of 8 (or the full extent when rows is small).
    if rows_tile is None:
        budget_rows = max(8, (2 << 20) // (c * 128 * 4))
        rows_tile = min(512, budget_rows)
    if rows_tile >= rows:
        rows_tile = rows                                    # full extent is always legal
    else:
        rows_tile = max(8, (rows_tile // 8) * 8)
    total_tiles = -(-rows // rows_tile)

    # Spatial chunking so v7x's two TensorCores stay busy even for small N;
    # only split when it divides evenly (no wasted duplicate tiles).
    n_chunks = 2 if (total_tiles >= 2 and total_tiles % 2 == 0) else 1
    tiles_per_chunk = total_tiles // n_chunks

    alpha1d = jnp.asarray(alpha_vec, jnp.float32).reshape(c)

    kernel = functools.partial(
        _focal_kernel, gamma=float(gamma), smooth=smooth, num_class=c,
        rows_tile=rows_tile, tiles_per_chunk=tiles_per_chunk, total_rows=rows)

    sum_f, sum_a = pl.pallas_call(
        kernel,
        out_shape=(jax.ShapeDtypeStruct((n, n_chunks, 1, 1), jnp.float32),
                   jax.ShapeDtypeStruct((n, n_chunks, 1, 1), jnp.float32)),
        grid_spec=pltpu.PrefetchScalarGridSpec(
            num_scalar_prefetch=0,
            grid=(n, n_chunks, tiles_per_chunk),
            in_specs=[
                pl.BlockSpec((1, c, rows_tile, 128),
                             lambda b, ch, s: (b, 0, ch * tiles_per_chunk + s, 0)),
                pl.BlockSpec((1, rows_tile, 128),
                             lambda b, ch, s: (b, ch * tiles_per_chunk + s, 0)),
                pl.BlockSpec(memory_space=pltpu.MemorySpace.SMEM),   # alpha (C,)
            ],
            out_specs=(
                pl.BlockSpec((1, 1, 1, 1), lambda b, ch, s: (b, ch, 0, 0)),
                pl.BlockSpec((1, 1, 1, 1), lambda b, ch, s: (b, ch, 0, 0)),
            ),
            scratch_shapes=[pltpu.VMEM((rows_tile, 128), jnp.float32),
                            pltpu.VMEM((rows_tile, 128), jnp.float32)],
        ),
        compiler_params=pltpu.CompilerParams(
            dimension_semantics=("parallel", "parallel", "arbitrary"),
            vmem_limit_bytes=32 * 1024 * 1024),
    )(xr, tr, alpha1d)

    sum_f = jnp.sum(sum_f)
    sum_a = jnp.sum(sum_a)
    m_f = jnp.float32(m_pixels)
    if size_average:
        # mean of the module's (M,1,M) broadcast tensor == mean(alpha[t]) * mean(f)
        return (sum_a / m_f) * (sum_f / m_f)
    else:
        # sum of the (M,1,M) broadcast tensor == sum(alpha[t]) * sum(f)
        return sum_a * sum_f


def multi_focal_loss_ref(x, target, alpha_vec, *, gamma=2.0, size_average=True):
    """Pure-JAX reference replicating the PyTorch forward exactly (including
    the (M,1,1) x (M,) broadcasting of alpha[idx] against pt)."""
    n, c, h, w = x.shape
    logit = jax.nn.softmax(x.astype(jnp.float32), axis=1)
    logit = jnp.transpose(logit.reshape(n, c, -1), (0, 2, 1)).reshape(-1, c)
    tgt = target.reshape(-1, 1)
    one_hot = (jnp.arange(c)[None, :] == tgt).astype(jnp.float32)
    pt = jnp.sum(one_hot * logit, axis=1) + 1e-10
    logpt = jnp.log(pt)
    alpha = alpha_vec.reshape(c, 1)[tgt]                       # (M, 1, 1)
    loss = -1.0 * alpha * jnp.power(1.0 - pt, gamma) * logpt   # (M, 1, M)
    return loss.mean() if size_average else loss.sum()


if __name__ == "__main__":
    # Deterministic setup (MultiFocalLoss(num_class=4, alpha=[1,2,3,4], gamma=2)).
    num_class = 4
    gamma = 2.0
    alpha_list = np.array([1.0, 2.0, 3.0, 4.0], dtype=np.float32)
    alpha_vec = jnp.asarray(alpha_list / alpha_list.sum())     # normalized, as in __init__

    key = jax.random.PRNGKey(0)
    kx, kt = jax.random.split(key)
    x = jax.random.normal(kx, (2, num_class, 16, 16), dtype=jnp.float32)   # NCHW logits
    target = jax.random.randint(kt, (2, 16, 16), 0, num_class, dtype=jnp.int32)

    loss = multi_focal_loss_pallas(x, target, alpha_vec, gamma=gamma,
                                   smooth=None, size_average=True)
    loss = jax.block_until_ready(loss)

    ref = multi_focal_loss_ref(x, target, alpha_vec, gamma=gamma, size_average=True)
    np.testing.assert_allclose(np.asarray(loss), np.asarray(ref), rtol=1e-5, atol=1e-6)

    print("KERNEL_OK")
</pallas_src>

<mosaic_0001>
module attributes {stable_mosaic.version = 11 : i64} {
  func.func @_focal_kernel(%arg0: i32, %arg1: i32, %arg2: i32, %arg3: memref<1x4x2x128xf32, #tpu.memory_space<vmem>>, %arg4: memref<1x2x128xi32, #tpu.memory_space<vmem>>, %arg5: memref<4xf32, #tpu.memory_space<smem>>, %arg6: memref<1x1x1x1xf32, #tpu.memory_space<vmem>>, %arg7: memref<1x1x1x1xf32, #tpu.memory_space<vmem>>, %arg8: memref<2x128xf32, #tpu.memory_space<vmem>>, %arg9: memref<2x128xf32, #tpu.memory_space<vmem>>) attributes {dimension_semantics = [#tpu.dimension_semantics<parallel>, #tpu.dimension_semantics<parallel>, #tpu.dimension_semantics<arbitrary>], iteration_bounds = array<i64: 2, 1, 1>, scalar_prefetch = 0 : i64, scratch_operands = 2 : i64, tpu.core_type = #tpu.core_type<tc>, window_params = [{transform_indices = @transform_0, window_bounds = array<i64: 1, 4, 2, 128>}, {transform_indices = @transform_1, window_bounds = array<i64: 1, 2, 128>}, {transform_indices = @transform_2, window_bounds = array<i64: 4>}, {transform_indices = @transform_3, window_bounds = array<i64: 1, 1, 1, 1>}, {transform_indices = @transform_4, window_bounds = array<i64: 1, 1, 1, 1>}]} {
    %c0_i32 = arith.constant 0 : i32
    %0 = arith.cmpi eq, %arg2, %c0_i32 : i32
    %1 = arith.extui %0 : i1 to i32
    %c0_i32_0 = arith.constant 0 : i32
    %2 = arith.cmpi ne, %1, %c0_i32_0 : i32
    scf.if %2 {
      %cst_58 = arith.constant 0.000000e+00 : f32
      %98 = vector.broadcast %cst_58 : f32 to vector<1x1x1x1xf32>
      %c0_59 = arith.constant 0 : index
      %c0_60 = arith.constant 0 : index
      %c0_61 = arith.constant 0 : index
      %c0_62 = arith.constant 0 : index
      %99 = vector.load %arg6[%c0_59, %c0_60, %c0_61, %c0_62] : memref<1x1x1x1xf32, #tpu.memory_space<vmem>>, vector<1x1x1x1xf32>
      tpu.vector_store %arg6[%c0_59, %c0_60, %c0_61, %c0_62], %98 {strides = array<i32>} : memref<1x1x1x1xf32, #tpu.memory_space<vmem>>, vector<1x1x1x1xf32>,
      %cst_63 = arith.constant 0.000000e+00 : f32
      %100 = vector.broadcast %cst_63 : f32 to vector<1x1x1x1xf32>
      %c0_64 = arith.constant 0 : index
      %c0_65 = arith.constant 0 : index
      %c0_66 = arith.constant 0 : index
      %c0_67 = arith.constant 0 : index
      %101 = vector.load %arg7[%c0_64, %c0_65, %c0_66, %c0_67] : memref<1x1x1x1xf32, #tpu.memory_space<vmem>>, vector<1x1x1x1xf32>
      tpu.vector_store %arg7[%c0_64, %c0_65, %c0_66, %c0_67], %100 {strides = array<i32>} : memref<1x1x1x1xf32, #tpu.memory_space<vmem>>, vector<1x1x1x1xf32>,
      %cst_68 = arith.constant 0.000000e+00 : f32
      %102 = vector.broadcast %cst_68 : f32 to vector<2x128xf32>
      %c0_69 = arith.constant 0 : index
      %c0_70 = arith.constant 0 : index
      %103 = vector.load %arg8[%c0_69, %c0_70] : memref<2x128xf32, #tpu.memory_space<vmem>>, vector<2x128xf32>
      tpu.vector_store %arg8[%c0_69, %c0_70], %102 {strides = array<i32>} : memref<2x128xf32, #tpu.memory_space<vmem>>, vector<2x128xf32>,
      %cst_71 = arith.constant 0.000000e+00 : f32
      %104 = vector.broadcast %cst_71 : f32 to vector<2x128xf32>
      %c0_72 = arith.constant 0 : index
      %c0_73 = arith.constant 0 : index
      %105 = vector.load %arg9[%c0_72, %c0_73] : memref<2x128xf32, #tpu.memory_space<vmem>>, vector<2x128xf32>
      tpu.vector_store %arg9[%c0_72, %c0_73], %104 {strides = array<i32>} : memref<2x128xf32, #tpu.memory_space<vmem>>, vector<2x128xf32>,
    } else {
    }
    %c0 = arith.constant 0 : index
    %c0_1 = arith.constant 0 : index
    %c0_2 = arith.constant 0 : index
    %3 = vector.load %arg4[%c0, %c0_1, %c0_2] : memref<1x2x128xi32, #tpu.memory_space<vmem>>, vector<1x2x128xi32>
    %4 = vector.shape_cast %3 : vector<1x2x128xi32> to vector<2x128xi32>
    %c1_i32 = arith.constant 1 : i32
    %5 = arith.muli %arg1, %c1_i32 : i32
    %6 = arith.addi %5, %arg2 : i32
    %c2_i32 = arith.constant 2 : i32
    %7 = arith.muli %6, %c2_i32 : i32
    %8 = tpu.iota {dimensions = array<i32: 0>} : vector<2x128xi32>
    %9 = vector.broadcast %7 : i32 to vector<2x128xi32>
    %10 = arith.addi %9, %8 : vector<2x128xi32>
    %c2_i32_3 = arith.constant 2 : i32
    %11 = vector.broadcast %c2_i32_3 : i32 to vector<2x128xi32>
    %12 = arith.cmpi slt, %10, %11 : vector<2x128xi32>
    %c0_i32_4 = arith.constant 0 : i32
    %13 = vector.broadcast %c0_i32_4 : i32 to vector<2x128xi32>
    %14 = arith.cmpi sge, %4, %13 : vector<2x128xi32>
    %15 = arith.andi %12, %14 : vector<2x128xi1>
    %c0_5 = arith.constant 0 : index
    %c0_6 = arith.constant 0 : index
    %c0_7 = arith.constant 0 : index
    %c0_8 = arith.constant 0 : index
    %16 = vector.load %arg3[%c0_5, %c0_6, %c0_7, %c0_8] : memref<1x4x2x128xf32, #tpu.memory_space<vmem>>, vector<1x1x2x128xf32>
    %17 = vector.shape_cast %16 : vector<1x1x2x128xf32> to vector<2x128xf32>
    %c0_9 = arith.constant 0 : index
    %c1 = arith.constant 1 : index
    %c0_10 = arith.constant 0 : index
    %c0_11 = arith.constant 0 : index
    %18 = vector.load %arg3[%c0_9, %c1, %c0_10, %c0_11] : memref<1x4x2x128xf32, #tpu.memory_space<vmem>>, vector<1x1x2x128xf32>
    %19 = vector.shape_cast %18 : vector<1x1x2x128xf32> to vector<2x128xf32>
    %20 = arith.maximumf %17, %19 : vector<2x128xf32>
    %c0_12 = arith.constant 0 : index
    %c2 = arith.constant 2 : index
    %c0_13 = arith.constant 0 : index
    %c0_14 = arith.constant 0 : index
    %21 = vector.load %arg3[%c0_12, %c2, %c0_13, %c0_14] : memref<1x4x2x128xf32, #tpu.memory_space<vmem>>, vector<1x1x2x128xf32>
    %22 = vector.shape_cast %21 : vector<1x1x2x128xf32> to vector<2x128xf32>
    %23 = arith.maximumf %20, %22 : vector<2x128xf32>
    %c0_15 = arith.constant 0 : index
    %c3 = arith.constant 3 : index
    %c0_16 = arith.constant 0 : index
    %c0_17 = arith.constant 0 : index
    %24 = vector.load %arg3[%c0_15, %c3, %c0_16, %c0_17] : memref<1x4x2x128xf32, #tpu.memory_space<vmem>>, vector<1x1x2x128xf32>
    %25 = vector.shape_cast %24 : vector<1x1x2x128xf32> to vector<2x128xf32>
    %26 = arith.maximumf %23, %25 : vector<2x128xf32>
    %cst = arith.constant 0.000000e+00 : f32
    %27 = vector.broadcast %cst : f32 to vector<2x128xf32>
    %cst_18 = arith.constant 0.000000e+00 : f32
    %28 = vector.broadcast %cst_18 : f32 to vector<2x128xf32>
    %cst_19 = arith.constant 0.000000e+00 : f32
    %29 = vector.broadcast %cst_19 : f32 to vector<2x128xf32>
    %c0_20 = arith.constant 0 : index
    %c0_21 = arith.constant 0 : index
    %c0_22 = arith.constant 0 : index
    %c0_23 = arith.constant 0 : index
    %30 = vector.load %arg3[%c0_20, %c0_21, %c0_22, %c0_23] : memref<1x4x2x128xf32, #tpu.memory_space<vmem>>, vector<1x1x2x128xf32>
    %31 = vector.shape_cast %30 : vector<1x1x2x128xf32> to vector<2x128xf32>
    %32 = arith.subf %31, %26 : vector<2x128xf32>
    %33 = math.exp %32 : vector<2x128xf32>
    %34 = arith.addf %27, %33 : vector<2x128xf32>
    %c0_i32_24 = arith.constant 0 : i32
    %35 = vector.broadcast %c0_i32_24 : i32 to vector<2x128xi32>
    %36 = arith.cmpi eq, %4, %35 : vector<2x128xi32>
    %c0_25 = arith.constant 0 : index
    %37 = memref.load %arg5[%c0_25] : memref<4xf32, #tpu.memory_space<smem>>
    %38 = vector.broadcast %37 : f32 to vector<2x128xf32>
    %39 = arith.select %36, %38, %29 : vector<2x128xi1>, vector<2x128xf32>
    %40 = arith.select %36, %33, %28 : vector<2x128xi1>, vector<2x128xf32>
    %c0_26 = arith.constant 0 : index
    %c1_27 = arith.constant 1 : index
    %c0_28 = arith.constant 0 : index
    %c0_29 = arith.constant 0 : index
    %41 = vector.load %arg3[%c0_26, %c1_27, %c0_28, %c0_29] : memref<1x4x2x128xf32, #tpu.memory_space<vmem>>, vector<1x1x2x128xf32>
    %42 = vector.shape_cast %41 : vector<1x1x2x128xf32> to vector<2x128xf32>
    %43 = arith.subf %42, %26 : vector<2x128xf32>
    %44 = math.exp %43 : vector<2x128xf32>
    %45 = arith.addf %34, %44 : vector<2x128xf32>
    %c1_i32_30 = arith.constant 1 : i32
    %46 = vector.broadcast %c1_i32_30 : i32 to vector<2x128xi32>
    %47 = arith.cmpi eq, %4, %46 : vector<2x128xi32>
    %c1_31 = arith.constant 1 : index
    %48 = memref.load %arg5[%c1_31] : memref<4xf32, #tpu.memory_space<smem>>
    %49 = vector.broadcast %48 : f32 to vector<2x128xf32>
    %50 = arith.select %47, %49, %39 : vector<2x128xi1>, vector<2x128xf32>
    %51 = arith.select %47, %44, %40 : vector<2x128xi1>, vector<2x128xf32>
    %c0_32 = arith.constant 0 : index
    %c2_33 = arith.constant 2 : index
    %c0_34 = arith.constant 0 : index
    %c0_35 = arith.constant 0 : index
    %52 = vector.load %arg3[%c0_32, %c2_33, %c0_34, %c0_35] : memref<1x4x2x128xf32, #tpu.memory_space<vmem>>, vector<1x1x2x128xf32>
    %53 = vector.shape_cast %52 : vector<1x1x2x128xf32> to vector<2x128xf32>
    %54 = arith.subf %53, %26 : vector<2x128xf32>
    %55 = math.exp %54 : vector<2x128xf32>
    %56 = arith.addf %45, %55 : vector<2x128xf32>
    %c2_i32_36 = arith.constant 2 : i32
    %57 = vector.broadcast %c2_i32_36 : i32 to vector<2x128xi32>
    %58 = arith.cmpi eq, %4, %57 : vector<2x128xi32>
    %c2_37 = arith.constant 2 : index
    %59 = memref.load %arg5[%c2_37] : memref<4xf32, #tpu.memory_space<smem>>
    %60 = vector.broadcast %59 : f32 to vector<2x128xf32>
    %61 = arith.select %58, %60, %50 : vector<2x128xi1>, vector<2x128xf32>
    %62 = arith.select %58, %55, %51 : vector<2x128xi1>, vector<2x128xf32>
    %c0_38 = arith.constant 0 : index
    %c3_39 = arith.constant 3 : index
    %c0_40 = arith.constant 0 : index
    %c0_41 = arith.constant 0 : index
    %63 = vector.load %arg3[%c0_38, %c3_39, %c0_40, %c0_41] : memref<1x4x2x128xf32, #tpu.memory_space<vmem>>, vector<1x1x2x128xf32>
    %64 = vector.shape_cast %63 : vector<1x1x2x128xf32> to vector<2x128xf32>
    %65 = arith.subf %64, %26 : vector<2x128xf32>
    %66 = math.exp %65 : vector<2x128xf32>
    %67 = arith.addf %56, %66 : vector<2x128xf32>
    %c3_i32 = arith.constant 3 : i32
    %68 = vector.broadcast %c3_i32 : i32 to vector<2x128xi32>
    %69 = arith.cmpi eq, %4, %68 : vector<2x128xi32>
    %c3_42 = arith.constant 3 : index
    %70 = memref.load %arg5[%c3_42] : memref<4xf32, #tpu.memory_space<smem>>
    %71 = vector.broadcast %70 : f32 to vector<2x128xf32>
    %72 = arith.select %69, %71, %61 : vector<2x128xi1>, vector<2x128xf32>
    %73 = arith.select %69, %66, %62 : vector<2x128xi1>, vector<2x128xf32>
    %74 = tpu.reciprocal %67 : vector<2x128xf32> -> vector<2x128xf32>
    %75 = arith.mulf %73, %74 : vector<2x128xf32>
    %cst_43 = arith.constant 1.000000e-10 : f32
    %76 = vector.broadcast %cst_43 : f32 to vector<2x128xf32>
    %77 = arith.addf %75, %76 : vector<2x128xf32>
    %78 = math.log %77 : vector<2x128xf32>
    %cst_44 = arith.constant 1.000000e+00 : f32
    %79 = vector.broadcast %cst_44 : f32 to vector<2x128xf32>
    %80 = arith.subf %79, %77 : vector<2x128xf32>
    %81 = arith.mulf %80, %80 : vector<2x128xf32>
    %cst_45 = arith.constant 0.000000e+00 : f32
    %82 = vector.broadcast %cst_45 : f32 to vector<2x128xf32>
    %83 = arith.subf %82, %81 : vector<2x128xf32>
    %84 = arith.mulf %83, %78 : vector<2x128xf32>
    %c0_46 = arith.constant 0 : index
    %c0_47 = arith.constant 0 : index
    %85 = vector.load %arg8[%c0_46, %c0_47] : memref<2x128xf32, #tpu.memory_space<vmem>>, vector<2x128xf32>
    %cst_48 = arith.constant 0.000000e+00 : f32
    %86 = vector.broadcast %cst_48 : f32 to vector<2x128xf32>
    %87 = arith.select %15, %84, %86 : vector<2x128xi1>, vector<2x128xf32>
    %88 = arith.addf %85, %87 : vector<2x128xf32>
    %c0_49 = arith.constant 0 : index
    %c0_50 = arith.constant 0 : index
    %89 = vector.load %arg8[%c0_49, %c0_50] : memref<2x128xf32, #tpu.memory_space<vmem>>, vector<2x128xf32>
    tpu.vector_store %arg8[%c0_49, %c0_50], %88 {strides = array<i32>} : memref<2x128xf32, #tpu.memory_space<vmem>>, vector<2x128xf32>,
    %c0_51 = arith.constant 0 : index
    %c0_52 = arith.constant 0 : index
    %90 = vector.load %arg9[%c0_51, %c0_52] : memref<2x128xf32, #tpu.memory_space<vmem>>, vector<2x128xf32>
    %cst_53 = arith.constant 0.000000e+00 : f32
    %91 = vector.broadcast %cst_53 : f32 to vector<2x128xf32>
    %92 = arith.select %15, %72, %91 : vector<2x128xi1>, vector<2x128xf32>
    %93 = arith.addf %90, %92 : vector<2x128xf32>
    %c0_54 = arith.constant 0 : index
    %c0_55 = arith.constant 0 : index
    %94 = vector.load %arg9[%c0_54, %c0_55] : memref<2x128xf32, #tpu.memory_space<vmem>>, vector<2x128xf32>
    tpu.vector_store %arg9[%c0_54, %c0_55], %93 {strides = array<i32>} : memref<2x128xf32, #tpu.memory_space<vmem>>, vector<2x128xf32>,
    %c0_i32_56 = arith.constant 0 : i32
    %95 = arith.cmpi eq, %arg2, %c0_i32_56 : i32
    %96 = arith.extui %95 : i1 to i32
    %c0_i32_57 = arith.constant 0 : i32
    %97 = arith.cmpi ne, %96, %c0_i32_57 : i32
    scf.if %97 {
      %c0_58 = arith.constant 0 : index
      %c0_59 = arith.constant 0 : index
      %c0_60 = arith.constant 0 : index
      %c0_61 = arith.constant 0 : index
      %98 = vector.load %arg6[%c0_58, %c0_59, %c0_60, %c0_61] : memref<1x1x1x1xf32, #tpu.memory_space<vmem>>, vector<1x1x1x1xf32>
      %c0_62 = arith.constant 0 : index
      %c0_63 = arith.constant 0 : index
      %99 = vector.load %arg8[%c0_62, %c0_63] : memref<2x128xf32, #tpu.memory_space<vmem>>, vector<2x128xf32>
      %100 = vector.shape_cast %99 : vector<2x128xf32> to vector<1x2x128xf32>
      %cst_64 = arith.constant dense<0.000000e+00> : vector<1xf32>
      %101 = vector.multi_reduction <add>, %100, %cst_64 [1, 2] : vector<1x2x128xf32> to vector<1xf32>
      %102 = vector.shape_cast %101 : vector<1xf32> to vector<1x1x1xf32>
      %103 = vector.extract %102[0, 0, 0] : f32 from vector<1x1x1xf32>
      %104 = vector.broadcast %103 : f32 to vector<1x1x1x1xf32>
      %105 = arith.addf %98, %104 : vector<1x1x1x1xf32>
      %c0_65 = arith.constant 0 : index
      %c0_66 = arith.constant 0 : index
      %c0_67 = arith.constant 0 : index
      %c0_68 = arith.constant 0 : index
      %106 = vector.load %arg6[%c0_65, %c0_66, %c0_67, %c0_68] : memref<1x1x1x1xf32, #tpu.memory_space<vmem>>, vector<1x1x1x1xf32>
      tpu.vector_store %arg6[%c0_65, %c0_66, %c0_67, %c0_68], %105 {strides = array<i32>} : memref<1x1x1x1xf32, #tpu.memory_space<vmem>>, vector<1x1x1x1xf32>,
      %c0_69 = arith.constant 0 : index
      %c0_70 = arith.constant 0 : index
      %c0_71 = arith.constant 0 : index
      %c0_72 = arith.constant 0 : index
      %107 = vector.load %arg7[%c0_69, %c0_70, %c0_71, %c0_72] : memref<1x1x1x1xf32, #tpu.memory_space<vmem>>, vector<1x1x1x1xf32>
      %c0_73 = arith.constant 0 : index
      %c0_74 = arith.constant 0 : index
      %108 = vector.load %arg9[%c0_73, %c0_74] : memref<2x128xf32, #tpu.memory_space<vmem>>, vector<2x128xf32>
      %109 = vector.shape_cast %108 : vector<2x128xf32> to vector<1x2x128xf32>
      %cst_75 = arith.constant dense<0.000000e+00> : vector<1xf32>
      %110 = vector.multi_reduction <add>, %109, %cst_75 [1, 2] : vector<1x2x128xf32> to vector<1xf32>
      %111 = vector.shape_cast %110 : vector<1xf32> to vector<1x1x1xf32>
      %112 = vector.extract %111[0, 0, 0] : f32 from vector<1x1x1xf32>
      %113 = vector.broadcast %112 : f32 to vector<1x1x1x1xf32>
      %114 = arith.addf %107, %113 : vector<1x1x1x1xf32>
      %c0_76 = arith.constant 0 : index
      %c0_77 = arith.constant 0 : index
      %c0_78 = arith.constant 0 : index
      %c0_79 = arith.constant 0 : index
      %115 = vector.load %arg7[%c0_76, %c0_77, %c0_78, %c0_79] : memref<1x1x1x1xf32, #tpu.memory_space<vmem>>, vector<1x1x1x1xf32>
      tpu.vector_store %arg7[%c0_76, %c0_77, %c0_78, %c0_79], %114 {strides = array<i32>} : memref<1x1x1x1xf32, #tpu.memory_space<vmem>>, vector<1x1x1x1xf32>,
    } else {
    }
    return
  }
  func.func @transform_0(%arg0: i32, %arg1: i32, %arg2: i32) -> (i32, i32, i32, i32) {
    %c1_i32 = arith.constant 1 : i32
    %0 = arith.muli %arg1, %c1_i32 : i32
    %1 = arith.addi %0, %arg2 : i32
    %c0_i32 = arith.constant 0 : i32
    %c0_i32_0 = arith.constant 0 : i32
    %c0_i32_1 = arith.constant 0 : i32
    return %arg0, %c0_i32, %1, %c0_i32_0 : i32, i32, i32, i32
  }
  func.func @transform_1(%arg0: i32, %arg1: i32, %arg2: i32) -> (i32, i32, i32) {
    %c1_i32 = arith.constant 1 : i32
    %0 = arith.muli %arg1, %c1_i32 : i32
    %1 = arith.addi %0, %arg2 : i32
    %c0_i32 = arith.constant 0 : i32
    %c0_i32_0 = arith.constant 0 : i32
    return %arg0, %1, %c0_i32 : i32, i32, i32
  }
  func.func @transform_2(%arg0: i32, %arg1: i32, %arg2: i32) -> i32 {
    %c0_i32 = arith.constant 0 : i32
    %c0_i32_0 = arith.constant 0 : i32
    return %c0_i32 : i32
  }
  func.func @transform_3(%arg0: i32, %arg1: i32, %arg2: i32) -> (i32, i32, i32, i32) {
    %c0_i32 = arith.constant 0 : i32
    %c0_i32_0 = arith.constant 0 : i32
    %c0_i32_1 = arith.constant 0 : i32
    return %arg0, %arg1, %c0_i32, %c0_i32_0 : i32, i32, i32, i32
  }
  func.func @transform_4(%arg0: i32, %arg1: i32, %arg2: i32) -> (i32, i32, i32, i32) {
    %c0_i32 = arith.constant 0 : i32
    %c0_i32_0 = arith.constant 0 : i32
    %c0_i32_1 = arith.constant 0 : i32
    return %arg0, %arg1, %c0_i32, %c0_i32_0 : i32, i32, i32, i32
  }
}

</mosaic_0001>

<bundles_post_ra>
// kernel: tpu_custom_call.1
= control target key start
LH: loop header
LB: loop body
LE: loop exit
PB: predicated region body
PF: predicated region fallthrough
CT: control target
= control target key end

     0   :  { %s1085_s0 = inlined_call_operand.hbm [shape: f32[2,4,2,128], index: 0, kind: input, shape index: {}]   ;;  %s1086_s1 = inlined_call_operand.hbm [shape: s32[2,2,128], index: 1, kind: input, shape index: {}]   ;;  %s1087_s2 = inlined_call_operand.vmem [shape: f32[4], index: 2, kind: input, shape index: {}]   ;;  %s1088_s3 = inlined_call_operand.vmem [shape: f32[2,1,1,1], index: 3, kind: output, shape index: {0}]   ;;  %s1089_s4 = inlined_call_operand.vmem [shape: f32[2,1,1,1], index: 4, kind: output, shape index: {1}]  }
   0x1   :  { %1094 = sst [smem:[#allocation13_spill]] %s1085_s0 }
   0x2   :  { %10 = vsyncpa [#allocation5], 0 }
   0x3   :  { %12 = vsyncpa [#allocation5 + $0x1], 0 }
   0x4   :  { %13 = vsyncpa [#allocation8], 0 }
   0x5   :  { %15 = vsyncpa [#allocation8 + $0x1], 0 }
   0x6   :  { %16 = vsyncpa [#allocation6], 0  ;;  %s874_s15 = smov 0   ;;  %s876_s16 = smov 0  }
   0x7   :  { %s878_s17 = smov 0   ;;  %s880_s18 = smov 0  }
   0x8   :  { %s882_s19 = smov 0   ;;  %s884_s20 = smov 0  }
   0x9 LB: > { %s595_s21 = sadd.s32 4294967295, %s841_s20   ;;  %s52_s22 = sadd.s32 1, %s829_s17  ;;  %s841_s20 = sphi %s884_s20, %s22_s20   ;;  %s837_s19 = sphi %s882_s19, %s1110_s19   ;;  %s833_s18 = sphi %s880_s18, %s1109_s18   ;;  %s829_s17 = sphi %s878_s17, %s1108_s17   ;;  %s825_s16 = sphi %s876_s16, %s1107_s16   ;;  %s821_s15 = sphi %s874_s15, %s1106_s15  }
   0xa   : > { %p59_p0 = scmp.ne.s32.totalorder %s829_s17, %s825_s16  ;;  %p60_p1 = scmp.eq.s32.totalorder %s841_s20, 0 }
   0xb   : > { %p65_p2 = scmp.ne.s32.totalorder %s825_s16, %s821_s15  ;;  %p908_p3 = scmp.eq.s32.totalorder %s595_s21, 0 }
   0xc   : > { %p61_p4 = por %p60_p1, %p59_p0  ;;  %p597_p5 = scmp.ge.s32.totalorder %s841_s20, 1 }
   0xd   : > { %s1095_s23 = scalar_select %p908_p3, 1, 0 }
   0xe   : > { %p915_p6 = por %p908_p3, %p65_p2  ;;  %p183_p7 = scmp.lt.s32.totalorder %s841_s20, 3 }
   0xf   : > { %s196_s27 = sshll.u32 %s1087_s2, 4  ;;  %p642_p10 = scmp.lt.s32.totalorder %s841_s20, 2  ;;  %s197_s27 = int_to_ptr.vmem [resolvable:$true] %s196_s27 }
  0x10   : > { %s1096_s24 = scalar_select %p915_p6, 1, 0 }
  0x11   : > { %p923_p8 = pnand %p597_p5, %p183_p7  ;;  %s931_s29 = sand.u32 1, %s829_s17  }
  0x12   : > { %p935_p12 = pnand %p642_p10, %p61_p4  ;;  %s708_s5 = scalar_lea.vmem %s197_s27, 16 }
  0x13   : > { %s1097_s28 = scalar_select %p923_p8, 1, 0 }
  0x14   : > { %p630_p9 = pneg %p923_p8  ;;  %p709_p13 = scmp.ne.s32.totalorder %s197_s27, %s708_s5 }
  0x15   : > { %p716_p5 = scmp.lt.s32.totalorder %s197_s27, %s197_s27  ;;  %p717_p7 = scmp.lt.s32.totalorder %s708_s5, %s708_s5 }
  0x16   : > { %p631_p11 = pnand %p630_p9, %p908_p3 }
  0x17   : > { %p718_p6 = por %p717_p7, %p716_p5 }
  0x18   : > { %p710_p0 = pneg %p631_p11 }
  0x1a   : > { %p711_p1 = pnand %p710_p0, %p709_p13 }
  0x1c   : > { %p712_p2 = pneg %p711_p1 }
  0x1e   : > { %p719_p8 = pnand %p718_p6, %p712_p2 }
  0x20   : > { %722 = shalt.err (!%p719_p8)
}
  0x21   : > { %s843_s6 = smov [#allocation9]   ;;  %s41_s7 = sadd.s32 1, %s837_s19 }
  0x22   : > { %633 = dma.vmem_to_smem (!%p631_p11), %s197_s27, 16, %s843_s6, [#allocation6]  }
  0x23   : > { %s600_s8 = sshll.u32 %s931_s29, 3  ;;  %p43_p4 = scmp.ge.s32.totalorder %s41_s7, 2 }
  0x24   : > { %s617_s9 = sshll.u32 %s837_s19, 7  ;;  %s211_s10 = scalar_lea.vmem [#allocation4], %s600_s8 }
  0x25   : > { %s220_s11 = sshll.u32 %s211_s10, 4  ;;  %s1112_s7 = smov (%p43_p4, %s41_s7), 0  ;;  %s949_s11 = int_to_ptr.vmem [resolvable:$true] %s220_s11 }
  0x26   : > { %s1099_s0 = sld [smem:[#allocation13_spill]]  ;;  %s47_s15 = ssub.s32 %s837_s19, %s1112_s7 }
  0x27   : > { %p953_p6 = scmp.eq.s32.totalorder %s47_s15, 0  ;;  %s208_s25 = scalar_lea.sflag [#allocation5], %s931_s29 }
  0x28   : > { %p725_p9 = pneg %p935_p12 }
  0x2c   : > { %s947_s14 = scalar_lea.hbm %s1099_s0, %s617_s9  ;;  %s728_s6 = scalar_lea.hbm %s1099_s0, 256 }
  0x2d   : > { %s723_s26 = scalar_lea.hbm %s947_s14, 128  ;;  %p729_p13 = scmp.lt.u32.totalorder %s947_s14, %s1099_s0 }
  0x2e   : > { %p724_p8 = scmp.ne.s32.totalorder %s947_s14, %s723_s26  ;;  %p730_p0 = scmp.lt.u32.totalorder %s728_s6, %s723_s26 }
  0x2f   : > { %p732_p2 = scmp.lt.u32.totalorder %s723_s26, %s947_s14 }
  0x30   : > { %p726_p10 = pnand %p725_p9, %p724_p8  ;;  %p731_p1 = por %p730_p0, %p729_p13 }
  0x32   : > { %p727_p11 = pneg %p726_p10  ;;  %p733_p5 = por %p732_p2, %p731_p1 }
  0x34   : > { %p734_p7 = pnand %p733_p5, %p727_p11 }
  0x36   : > { %737 = shalt.err (!%p734_p7)
}
  0x37   : > { %s738_s10 = scalar_lea.vmem %s949_s11, 128  ;;  %s844_s12 = smov [#allocation4]  }
  0x38   : > { %p739_p4 = scmp.ne.s32.totalorder %s949_s11, %s738_s10  ;;  %s743_s13 = sshll.u32 %s844_s12, 4  ;;  %s744_s13 = int_to_ptr.vmem [resolvable:$false] %s743_s13 }
  0x39   : > { %s745_s15 = scalar_lea.vmem %s744_s13, 256  ;;  %p746_p3 = scmp.lt.s32.totalorder %s949_s11, %s744_s13 }
  0x3a   : > { %p741_p8 = pnand %p739_p4, %p725_p9  ;;  %p747_p13 = scmp.lt.s32.totalorder %s745_s15, %s738_s10 }
  0x3c   : > { %p742_p10 = pneg %p741_p8  ;;  %p748_p0 = por %p747_p13, %p746_p3 }
  0x3e   : > { %p749_p1 = pnand %p748_p0, %p742_p10 }
  0x40   : > { %752 = shalt.err (!%p749_p1)
}
  0x41   : > { %s845_s26 = smov 32   ;;  %s846_s27 = smov 2  }
  0x42   : > { %637 = dma.hbm_to_vmem [thread:$0]  (!%p935_p12), %s947_s14, 128, %s949_s11, %s208_s25, %s845_s26, %s845_s26, %s846_s27  }
  0x43   : > { %s990_s5 = scalar_select %p953_p6, %s829_s17, %s52_s22  }
  0x44   : > { %s603_s6 = sshll.u32 %s931_s29, 1  ;;  %s604_s8 = sshll.u32 %s837_s19, 5 }
  0x45   : > { %s997_s12 = scalar_lea.hbm %s1086_s1, %s604_s8  ;;  %s234_s13 = scalar_lea.vmem [#allocation7], %s603_s6 }
  0x46   : > { %s243_s15 = sshll.u32 %s234_s13, 4  ;;  %s231_s0 = scalar_lea.sflag [#allocation8], %s931_s29  ;;  %s244_s15 = int_to_ptr.vmem [resolvable:$true] %s243_s15 }
  0x47   : > { %s753_s11 = scalar_lea.hbm %s997_s12, 32  ;;  %s758_s21 = scalar_lea.hbm %s1086_s1, 64 }
  0x48   : > { %p754_p3 = scmp.ne.s32.totalorder %s997_s12, %s753_s11  ;;  %p759_p2 = scmp.lt.u32.totalorder %s997_s12, %s1086_s1 }
  0x49   : > { %p760_p5 = scmp.lt.u32.totalorder %s758_s21, %s753_s11  ;;  %p762_p4 = scmp.lt.u32.totalorder %s753_s11, %s997_s12 }
  0x4a   : > { %p756_p6 = pnand %p754_p3, %p725_p9 }
  0x4b   : > { %p761_p7 = por %p760_p5, %p759_p2 }
  0x4c   : > { %p757_p11 = pneg %p756_p6 }
  0x4d   : > { %p763_p8 = por %p762_p4, %p761_p7 }
  0x4f   : > { %p764_p10 = pnand %p763_p8, %p757_p11 }
  0x51   : > { %767 = shalt.err (!%p764_p10)
}
  0x52   : > { %s768_s29 = scalar_lea.vmem %s244_s15, 32  ;;  %s847_s27 = smov [#allocation7]  }
  0x53   : > { %p769_p13 = scmp.ne.s32.totalorder %s244_s15, %s768_s29  ;;  %s773_s6 = sshll.u32 %s847_s27, 4  ;;  %s774_s6 = int_to_ptr.vmem [resolvable:$false] %s773_s6 }
  0x54   : > { %s775_s8 = scalar_lea.vmem %s774_s6, 64  ;;  %p776_p3 = scmp.lt.s32.totalorder %s244_s15, %s774_s6 }
  0x55   : > { %p771_p0 = pnand %p769_p13, %p725_p9  ;;  %p777_p6 = scmp.lt.s32.totalorder %s775_s8, %s768_s29 }
  0x57   : > { %p772_p1 = pneg %p771_p0  ;;  %p778_p2 = por %p777_p6, %p776_p3 }
  0x59   : > { %p779_p5 = pnand %p778_p2, %p772_p1 }
  0x5b   : > { %782 = shalt.err (!%p779_p5)
}
  0x5c   : > { %640 = dma.hbm_to_vmem [thread:$0]  (!%p935_p12), %s997_s12, 32, %s244_s15, %s231_s0  }
  0x5d   : > { %p1101_p11 = scmp.ne.s32.totalorder %s1097_s28, 0 }
  0x5e   : > { %s254_s9 = sand.u32 (!%p1101_p11), 1, %s825_s16   ;;  %p1102_p9 = scmp.ne.s32.totalorder (!%p1101_p11), %s1096_s24, 0 }
  0x5f   : > { %252 = sbr.rel (%p1101_p11) target bundleno = 394 (0x18a), region = 32  ;;  %s606_s10 = sshll.u32 (!%p1101_p11), %s254_s9, 3 }
  0x60   : > { %s255_s13 = scalar_lea.sflag (!%p1101_p11), [#allocation5], %s254_s9  ;;  %s258_s11 = scalar_lea.vmem (!%p1101_p11), [#allocation4], %s606_s10 }
  0x66   : > { %808 = dma.done.wait (%p1102_p9), %s255_s13, 128  }
  0x67   : > { %810 = vsyncadd (%p1102_p9), %s255_s13, 4294967168  ;;  %s607_s22 = sshll.u32 %s254_s9, 1  ;;  %s264_s14 = scalar_lea.sflag [#allocation8], %s254_s9 }
  0x68   : > { %s267_s30 = scalar_lea.vmem [#allocation7], %s607_s22 }
  0x69   : > { %812 = dma.done.wait (%p1102_p9), %s264_s14, 32  }
  0x6a   : > { %814 = vsyncadd (%p1102_p9), %s264_s14, 4294967264  ;;  %p1103_p12 = scmp.ne.s32.totalorder %s1095_s23, 0 }
  0x6c   : > { %816 = dma.done.wait (%p1103_p12), [#allocation6], 16  }
  0x6d   : > { %818 = vsyncadd (%p1103_p12), [#allocation6], 4294967280 }
  0x6e   : > { %276 = sfence }
  0x6f   : > { %v342_v0 = vld [vmem:[%s258_s11] sm:$0x3]  ;;  %v848_v1 = vmov 0.0   ;;  %v609_v2 = vld [vmem:[%s258_s11 + $0x2] sm:$0x3]  ;;  %v335_v5 = vlaneseq  ;;  %s357_s0 = sld [smem:[#allocation9]] }
  0x70   : > { %330 = vst [vmem:[#allocation2] sm:$0x3] %v848_v1  ;;  %v610_v3 = vld [vmem:[%s258_s11 + $0x4] sm:$0x3]  ;;  %331 = vst [vmem:[#allocation3] sm:$0x3] %v848_v1  ;;  %v345_v4 = vmax.f32 %v342_v0, %v609_v2 }
  0x71   : > { %v611_v6 = vld [vmem:[%s258_s11 + $0x6] sm:$0x3]  ;;  %s612_s24 = sld [smem:[#allocation9 + $0x1]]  ;;  %s613_s28 = sld [smem:[#allocation9 + $0x2]]  ;;  %v332_v8 = vld [vmem:[%s267_s30] sm:$0x3] }
  0x72   : > { %v348_v7 = vmax.f32 %v345_v4, %v610_v3  ;;  %s614_s12 = sld [smem:[#allocation9 + $0x3]]  ;;  %v336_v10 = vshrl.u32 %v335_v5, 7  ;;  %vm340_vm0 = vcmp.ge.s32.totalorder %v332_v8, 0  ;;  %vm356_vm1 = vcmp.eq.s32.totalorder %v332_v8, 0  ;;  %p311_p7 = scmp.lt.s32.totalorder %s833_s18, 1 }
  0x73   : > { %vm365_vm2 = vcmp.eq.s32.totalorder %v332_v8, 1  ;;  %vm374_vm4 = vcmp.eq.s32.totalorder %v332_v8, 2  ;;  %vm383_vm5 = vcmp.eq.s32.totalorder %v332_v8, 3  ;;  %vm410_vm7 = vcmask 1041408  }
  0x74   : > { %v351_v9 = vmax.f32 %v348_v7, %v611_v6  ;;  %vm339_vm3 = vcmp.lt.s32.totalorder %v336_v10, 2  ;;  %s1114_s18 = smov (!%p311_p7, %s833_s18), 1  ;;  %vm327_vm8 = vcmask 0  }
  0x75   : > { %v358_v15 = vstv %s357_s0  ;;  %vm1040_vm6 = vmand %vm339_vm3, %vm340_vm0  ;;  %s316_s21 = scalar_lea.vmem %s1088_s3, %s1114_s18  ;;  %s322_s29 = scalar_lea.vmem %s1089_s4, %s1114_s18 }
  0x76   : > { %v352_v11 = vsub.f32 %v342_v0, %v351_v9  ;;  %v361_v12 = vsub.f32 %v609_v2, %v351_v9  ;;  %v370_v13 = vsub.f32 %v610_v3, %v351_v9  ;;  %v379_v14 = vsub.f32 %v611_v6, %v351_v9  ;;  %328 = vst.msk [vmem:[%s316_s21] sm:$0x1] %vm327_vm8, %v848_v1 }
  0x77   : > { %v367_v16 = vstv %s612_s24  ;;  %v376_v20 = vstv %s613_s28  ;;  %v359_v22 = vsel %vm356_vm1, %v358_v15, 0.0  ;;  %v401_v26 = vld [vmem:[#allocation3] sm:$0x3]  ;;  %v397_v51 = vld [vmem:[#allocation2] sm:$0x3] }
  0x78   : > { %v353_v17 = vmul.f32 1.442695, %v352_v11  ;;  %v362_v18 = vmul.f32 1.442695, %v361_v12  ;;  %v371_v19 = vmul.f32 1.442695, %v370_v13  ;;  %v385_v23 = vstv %s614_s12 }
  0x79   : > { %v380_v21 = vmul.f32 1.442695, %v379_v14  ;;  %v368_v24 = vsel %vm365_vm2, %v367_v16, %v359_v22  ;;  %329 = vst.msk [vmem:[%s322_s29] sm:$0x1] %vm327_vm8, %v848_v1 }
  0x7a   : > { %696 = vpow2.f32 %v353_v17  ;;  %v377_v25 = vsel %vm374_vm4, %v376_v20, %v368_v24 }
  0x7b   : > { %698 = vpow2.f32 %v362_v18  ;;  %v386_v28 = vsel %vm383_vm5, %v385_v23, %v377_v25 }
  0x7c   : > { %700 = vpow2.f32 %v371_v19  ;;  %v402_v29 = vsel %vm1040_vm6, %v386_v28, 0.0 }
  0x7d   : > { %702 = vpow2.f32 %v380_v21  ;;  %v403_v30 = vadd.f32 %v402_v29, %v401_v26  ;;  %v408_v9 = vld [vmem:[%s316_s21] sm:$0x1] }
  0x7f   : > { %404 = vst [vmem:[#allocation3] sm:$0x3] %v403_v30 }
  0x80   : > { %v425_v11 = vld [vmem:[%s322_s29] sm:$0x1] }
  0x84   : > { %v697_v31 = vpop.eup %696 }
  0x85   : > { %v699_v32 = vpop.eup %698  ;;  %v360_v38 = vsel %vm356_vm1, %v697_v31, 0.0 }
  0x86   : > { %v701_v33 = vpop.eup %700  ;;  %v364_v34 = vadd.f32 %v699_v32, %v697_v31  ;;  %v369_v39 = vsel %vm365_vm2, %v699_v32, %v360_v38  ;;  %v426_v55 = vld [vmem:[#allocation3] sm:$0x3] }
  0x87   : > { %v703_v35 = vpop.eup %702  ;;  %v378_v40 = vsel %vm374_vm4, %v701_v33, %v369_v39  ;;  %v427_v57 = vsel %vm410_vm7, %v426_v55, 0.0 }
  0x88   : > { %v373_v36 = vadd.f32 %v701_v33, %v364_v34  ;;  %v387_v41 = vsel %vm383_vm5, %v703_v35, %v378_v40 }
  0x8a   : > { %v382_v37 = vadd.f32 %v703_v35, %v373_v36 }
  0x8c   : > { %704 = vrcp.f32 %v382_v37 }
  0x96   : > { %v705_v42 = vpop.eup %704 }
  0x97   : > { %v389_v43 = vmul.f32 %v705_v42, %v387_v41 }
  0x99   : > { %v390_v44 = vadd.f32 1e-10, %v389_v43 }
  0x9b   : > { %706 = vlog2.f32 %v390_v44  ;;  %v393_v45 = vsub.f32 1.0, %v390_v44 }
  0x9d   : > { %v394_v46 = vmul.f32 %v393_v45, %v393_v45 }
  0x9f   : > { %v395_v47 = vsub.f32 0.0, %v394_v46 }
  0xa5   : > { %v707_v48 = vpop.eup %706 }
  0xa6   : > { %v392_v49 = vmul.f32 0.6931472, %v707_v48 }
  0xa8   : > { %v396_v50 = vmul.f32 %v395_v47, %v392_v49 }
  0xaa   : > { %v398_v52 = vsel %vm1040_vm6, %v396_v50, 0.0 }
  0xab   : > { %v399_v53 = vadd.f32 %v398_v52, %v397_v51 }
  0xad   : > { %400 = vst [vmem:[#allocation2] sm:$0x3] %v399_v53 }
  0xb4   : > { %v409_v54 = vld [vmem:[#allocation2] sm:$0x3] }
  0xb5   : > { %v411_v56 = vsel %vm410_vm7, %v409_v54, 0.0 }
  0xb6   : > { %412 = vadd.xlane.f32.xlu0 %v411_v56 }
  0xba   : > { %428 = vadd.xlane.f32.xlu0 %v427_v57 }
 0x143   : > { %v413_v58 = vpop.xlane.xlu0 %412 }
 0x144   : > { %v414_v59 = vrot.slane %v413_v58, 4 }
 0x146   : > { %v415_v60 = vadd.f32 %v414_v59, %v413_v58 }
 0x147   : > { %v429_v61 = vpop.xlane.xlu0 %428 }
 0x148   : > { %v416_v62 = vrot.slane %v415_v60, 2  ;;  %v430_v63 = vrot.slane %v429_v61, 4 }
 0x14a   : > { %v431_v0 = vadd.f32 %v430_v63, %v429_v61  ;;  %v417_v2 = vadd.f32 %v416_v62, %v415_v60 }
 0x14c   : > { %v432_v3 = vrot.slane %v431_v0, 2  ;;  %v418_v4 = vrot.slane %v417_v2, 1 }
 0x14e   : > { %v433_v5 = vadd.f32 %v432_v3, %v431_v0  ;;  %v419_v6 = vadd.f32 %v418_v4, %v417_v2 }
 0x150   : > { %618 = vpush %v419_v6  ;;  %v434_v7 = vrot.slane %v433_v5, 1 }
 0x152   : > { %v435_v8 = vadd.f32 %v434_v7, %v433_v5 }
 0x154   : > { %620 = vpush %v435_v8 }
 0x181   : > { %s619_s18 = spop %618 }
 0x182   : > { %v421_v10 = vstv %s619_s18 }
 0x183   : > { %v422_v1 = vadd.f32 %v421_v10, %v408_v9 }
 0x185   : > { %424 = vst.msk [vmem:[%s316_s21] sm:$0x1] %vm327_vm8, %v422_v1  ;;  %s621_s27 = spop %620 }
 0x186   : > { %v437_v12 = vstv %s621_s27 }
 0x187   : > { %v438_v13 = vadd.f32 %v437_v12, %v425_v11 }
 0x189   : > { %439 = vst.msk [vmem:[%s322_s29] sm:$0x1] %vm327_vm8, %v438_v13 }
 0x18a PF: > { %s22_s20 = sadd.s32 1, %s841_s20   ;;  %s1106_s15 = smov %s825_s16 }
 0x18b   : > { %p19_p4 = scmp.ge.s32.totalorder %s22_s20, 4   ;;  %s1107_s16 = smov %s829_s17 }
 0x18c   : > { %s1108_s17 = smov %s990_s5  ;;  %s1109_s18 = smov %s837_s19 }
 0x18d   : > { %s1110_s19 = smov %s1112_s7  ;;  %21 = sbr.rel (!%p19_p4) target bundleno = 9 (0x9), region = 113 }
 0x194   :  { %481 = vsyncpa [#allocation5], 1 }
 0x195   :  { %483 = vsyncpa [#allocation5 + $0x1], 1 }
 0x196   :  { %484 = vsyncpa [#allocation8], 1 }
 0x197   :  { %486 = vsyncpa [#allocation8 + $0x1], 1 }
 0x198   :  { %487 = vsyncpa [#allocation6], 1 }
 0x199   :  { %489 = vsyncpa [#allocation6 + $0x1], 1 }

</bundles_post_ra>
